<compile_context>
chip_gen: v5e
topology: v5e:2x2
jax: 0.10.0
libtpu: 0.0.40
codegen_flags: <defaults>
</compile_context>

<pallas_src>
import functools

import jax
import jax.numpy as jnp
from jax.experimental import pallas as pl
from jax.experimental.pallas import tpu as pltpu

LANE = 128


def _round_up(x, m):
    return (x + m - 1) // m * m


def _cdiv(a, b):
    return -(-a // b)


def mlp_kernel(x_ref, w_in_ref, b_in_ref, w_h_ref, b_h_ref, w_out_ref, b_out_ref, o_ref):
    """One batch tile of the fused MLP. Weights are VMEM-resident bf16;
    accumulation / bias / sigmoid math is f32 (v5e-safe)."""

    def sigmoid(z):
        # sigmoid(z) == 0.5 * tanh(z/2) + 0.5  -> one EUP push, no VPU divide.
        return 0.5 * jnp.tanh(0.5 * z) + 0.5

    # Input layer: x tile is already bf16 (cast once in the wrapper).
    h = jnp.dot(x_ref[...], w_in_ref[...], preferred_element_type=jnp.float32)
    h = sigmoid(h + b_in_ref[...])

    # Hidden layers (static, tiny trip count -> unrolled at trace time).
    # TODO(synk): switch to lax.fori_loop(..., unroll=k) if L becomes large.
    n_hidden = w_h_ref.shape[0]
    for l in range(n_hidden):
        h = jnp.dot(h.astype(jnp.bfloat16), w_h_ref[l],
                    preferred_element_type=jnp.float32)
        h = sigmoid(h + b_h_ref[l])

    # Output layer (no activation).
    out = jnp.dot(h.astype(jnp.bfloat16), w_out_ref[...],
                  preferred_element_type=jnp.float32)
    o_ref[...] = (out + b_out_ref[...]).astype(o_ref.dtype)


def prepare_params(w_in, b_in, w_h, b_h, w_out, b_out):
    """One-time padding / casting of parameters (do NOT call per forward).

    Hidden (lane) dim is zero-padded to 128 so MXU/vreg tiles are full; zero
    pad is math-preserving: pad hidden lanes become sigmoid(0)=0.5 but the
    corresponding zero weight rows of the next layer annihilate them. Input
    and output feature dims are left unpadded.
    """
    H = w_in.shape[1]
    L = w_h.shape[0]
    h_p = _round_up(H, LANE)

    # Accept 1-D or 2-D biases.
    b_in = jnp.asarray(b_in).reshape(1, -1)
    b_h = jnp.asarray(b_h).reshape(L, 1, -1)
    b_out = jnp.asarray(b_out).reshape(1, -1)

    w_in_p = jnp.pad(w_in, ((0, 0), (0, h_p - H))).astype(jnp.bfloat16)
    b_in_p = jnp.pad(b_in, ((0, 0), (0, h_p - H))).astype(jnp.float32)
    w_h_p = jnp.pad(w_h, ((0, 0), (0, h_p - H), (0, h_p - H))).astype(jnp.bfloat16)
    b_h_p = jnp.pad(b_h, ((0, 0), (0, 0), (0, h_p - H))).astype(jnp.float32)
    w_out_p = jnp.pad(w_out, ((0, h_p - H), (0, 0))).astype(jnp.bfloat16)
    b_out_p = b_out.astype(jnp.float32)
    return w_in_p, b_in_p, w_h_p, b_h_p, w_out_p, b_out_p


@functools.partial(jax.jit, static_argnames=("block_b",))
def mlp_forward(x, w_in_p, b_in_p, w_h_p, b_h_p, w_out_p, b_out_p, *, block_b=1024):
    B, d_in = x.shape
    h_p = w_in_p.shape[1]
    L = w_h_p.shape[0]
    d_out = w_out_p.shape[1]

    # Batch tiling: roughly-equal tiles (multiple of 8 sublanes). Prefer >= 2
    # grid steps so v7x's second TensorCore has work, and cap pad waste by
    # splitting B evenly instead of rounding up to a full block_b.
    n_tiles = _cdiv(B, block_b)
    if n_tiles < 2 and B >= 16:
        n_tiles = 2
    tb = max(8, _round_up(_cdiv(B, n_tiles), 8))
    B_p = _round_up(B, tb)
    grid = (B_p // tb,)

    # Batch-pad only (no lane pad) and cast activations to bf16 once.
    xp = jnp.pad(x, ((0, B_p - B), (0, 0))).astype(jnp.bfloat16)

    out = pl.pallas_call(
        mlp_kernel,
        out_shape=jax.ShapeDtypeStruct((B_p, d_out), jnp.float32),
        grid_spec=pltpu.PrefetchScalarGridSpec(
            num_scalar_prefetch=0,
            grid=grid,
            in_specs=[
                # Activations: tiled over the batch grid, unpadded feature dim.
                pl.BlockSpec((tb, d_in), lambda i: (i, 0)),
                # Weights / biases: constant block index -> VMEM-resident.
                pl.BlockSpec((d_in, h_p), lambda i: (0, 0)),
                pl.BlockSpec((1, h_p), lambda i: (0, 0)),
                pl.BlockSpec((L, h_p, h_p), lambda i: (0, 0, 0)),
                pl.BlockSpec((L, 1, h_p), lambda i: (0, 0, 0)),
                pl.BlockSpec((h_p, d_out), lambda i: (0, 0)),
                pl.BlockSpec((1, d_out), lambda i: (0, 0)),
            ],
            # Unpadded output: d_out equals full array dim (masked vst, but
            # ~16x fewer output HBM bytes than the padded-f32 store).
            out_specs=pl.BlockSpec((tb, d_out), lambda i: (i, 0)),
        ),
        compiler_params=pltpu.CompilerParams(
            # Batch axis is embarrassingly parallel -> 2 TCs on v7x.
            dimension_semantics=("parallel",),
            vmem_limit_bytes=32 * 1024 * 1024,
        ),
    )(xp, w_in_p, b_in_p, w_h_p, b_h_p, w_out_p, b_out_p)

    return out[:B]


def init_params(key, input_, output_, hidden_layers, hidden):
    """Deterministic init mimicking nn.Linear's uniform(-1/sqrt(fan_in), 1/sqrt(fan_in))."""
    ks = jax.random.split(key, 6)

    def u(k, shape, fan_in):
        bound = 1.0 / jnp.sqrt(float(fan_in))
        return jax.random.uniform(k, shape, jnp.float32, -bound, bound)

    w_in = u(ks[0], (input_, hidden), input_)                  # (D_in, H)
    b_in = u(ks[1], (1, hidden), input_)                       # (1, H)
    w_h = u(ks[2], (hidden_layers, hidden, hidden), hidden)    # (L, H, H)
    b_h = u(ks[3], (hidden_layers, 1, hidden), hidden)         # (L, 1, H)
    w_out = u(ks[4], (hidden, output_), hidden)                # (H, D_out)
    b_out = u(ks[5], (1, output_), hidden)                     # (1, D_out)
    return w_in, b_in, w_h, b_h, w_out, b_out


if __name__ == "__main__":
    # Module config: NeuralNetwork(input_=16, output_=8, hidden_layers=2,
    #                              hidden_layers_input_output=32)
    input_, output_, hidden_layers, hidden = 16, 8, 2, 32
    batch = 8

    key = jax.random.PRNGKey(0)
    k_x, k_p = jax.random.split(key)
    x = jax.random.normal(k_x, (batch, input_), jnp.float32)
    params = init_params(k_p, input_, output_, hidden_layers, hidden)

    # One-time parameter preparation (padding + bf16 cast), reused per forward.
    prepared = prepare_params(*params)

    out = mlp_forward(x, *prepared)
    out = jax.block_until_ready(out)

    # Reference in plain f32 JAX (kernel uses bf16 matmul operands -> relaxed tol).
    w_in, b_in, w_h, b_h, w_out, b_out = params
    h = jax.nn.sigmoid(x @ w_in + b_in)
    for l in range(hidden_layers):
        h = jax.nn.sigmoid(h @ w_h[l] + b_h[l])
    ref = h @ w_out + b_out

    assert out.shape == (batch, output_)
    assert jnp.allclose(out, ref, atol=2e-2, rtol=2e-2), (
        f"max abs err {jnp.max(jnp.abs(out - ref))}")

    print("KERNEL_OK")
</pallas_src>

<mosaic_0001>
module attributes {stable_mosaic.version = 11 : i64} {
  func.func @mlp_kernel(%arg0: i32, %arg1: memref<8x16xbf16, #tpu.memory_space<vmem>>, %arg2: memref<16x128xbf16, #tpu.memory_space<vmem>>, %arg3: memref<1x128xf32, #tpu.memory_space<vmem>>, %arg4: memref<2x128x128xbf16, #tpu.memory_space<vmem>>, %arg5: memref<2x1x128xf32, #tpu.memory_space<vmem>>, %arg6: memref<128x8xbf16, #tpu.memory_space<vmem>>, %arg7: memref<1x8xf32, #tpu.memory_space<vmem>>, %arg8: memref<8x8xf32, #tpu.memory_space<vmem>>) attributes {dimension_semantics = [#tpu.dimension_semantics<parallel>], iteration_bounds = array<i64: 1>, scalar_prefetch = 0 : i64, scratch_operands = 0 : i64, tpu.core_type = #tpu.core_type<tc>, window_params = [{transform_indices = @transform_0, window_bounds = array<i64: 8, 16>}, {pipeline_mode = #tpu.pipeline_mode<synchronous>, transform_indices = @transform_1, window_bounds = array<i64: 16, 128>}, {pipeline_mode = #tpu.pipeline_mode<synchronous>, transform_indices = @transform_2, window_bounds = array<i64: 1, 128>}, {pipeline_mode = #tpu.pipeline_mode<synchronous>, transform_indices = @transform_3, window_bounds = array<i64: 2, 128, 128>}, {pipeline_mode = #tpu.pipeline_mode<synchronous>, transform_indices = @transform_4, window_bounds = array<i64: 2, 1, 128>}, {pipeline_mode = #tpu.pipeline_mode<synchronous>, transform_indices = @transform_5, window_bounds = array<i64: 128, 8>}, {pipeline_mode = #tpu.pipeline_mode<synchronous>, transform_indices = @transform_6, window_bounds = array<i64: 1, 8>}, {transform_indices = @transform_7, window_bounds = array<i64: 8, 8>}]} {
    %c0 = arith.constant 0 : index
    %c0_0 = arith.constant 0 : index
    %0 = vector.load %arg1[%c0, %c0_0] : memref<8x16xbf16, #tpu.memory_space<vmem>>, vector<8x16xbf16>
    %c0_1 = arith.constant 0 : index
    %c0_2 = arith.constant 0 : index
    %1 = vector.load %arg2[%c0_1, %c0_2] : memref<16x128xbf16, #tpu.memory_space<vmem>>, vector<16x128xbf16>
    %cst = arith.constant dense<0.000000e+00> : vector<8x128xf32>
    %2 = tpu.matmul %0, %1, %cst {dimension_numbers = #tpu.dot_dimension_numbers<[1], [0], [0], [1], [0, 0, 1, 1], [], []>} : vector<8x16xbf16>, vector<16x128xbf16>, vector<8x128xf32> -> vector<8x128xf32>
    %c0_3 = arith.constant 0 : index
    %c0_4 = arith.constant 0 : index
    %3 = vector.load %arg3[%c0_3, %c0_4] : memref<1x128xf32, #tpu.memory_space<vmem>>, vector<1x128xf32>
    %4 = vector.broadcast %3 : vector<1x128xf32> to vector<8x128xf32>
    %5 = arith.addf %2, %4 : vector<8x128xf32>
    %cst_5 = arith.constant 5.000000e-01 : f32
    %6 = vector.broadcast %cst_5 : f32 to vector<8x128xf32>
    %7 = arith.mulf %6, %5 : vector<8x128xf32>
    %8 = math.tanh %7 : vector<8x128xf32>
    %cst_6 = arith.constant 5.000000e-01 : f32
    %9 = vector.broadcast %cst_6 : f32 to vector<8x128xf32>
    %10 = arith.mulf %9, %8 : vector<8x128xf32>
    %cst_7 = arith.constant 5.000000e-01 : f32
    %11 = vector.broadcast %cst_7 : f32 to vector<8x128xf32>
    %12 = arith.addf %10, %11 : vector<8x128xf32>
    %13 = arith.truncf %12 : vector<8x128xf32> to vector<8x128xbf16>
    %c0_8 = arith.constant 0 : index
    %c0_9 = arith.constant 0 : index
    %c0_10 = arith.constant 0 : index
    %14 = vector.load %arg4[%c0_8, %c0_9, %c0_10] : memref<2x128x128xbf16, #tpu.memory_space<vmem>>, vector<1x128x128xbf16>
    %15 = vector.shape_cast %14 : vector<1x128x128xbf16> to vector<128x128xbf16>
    %cst_11 = arith.constant dense<0.000000e+00> : vector<8x128xf32>
    %16 = tpu.matmul %13, %15, %cst_11 {dimension_numbers = #tpu.dot_dimension_numbers<[1], [0], [0], [1], [0, 0, 1, 1], [], []>} : vector<8x128xbf16>, vector<128x128xbf16>, vector<8x128xf32> -> vector<8x128xf32>
    %c0_12 = arith.constant 0 : index
    %c0_13 = arith.constant 0 : index
    %c0_14 = arith.constant 0 : index
    %17 = vector.load %arg5[%c0_12, %c0_13, %c0_14] : memref<2x1x128xf32, #tpu.memory_space<vmem>>, vector<1x1x128xf32>
    %18 = vector.shape_cast %17 : vector<1x1x128xf32> to vector<1x128xf32>
    %19 = vector.broadcast %18 : vector<1x128xf32> to vector<8x128xf32>
    %20 = arith.addf %16, %19 : vector<8x128xf32>
    %cst_15 = arith.constant 5.000000e-01 : f32
    %21 = vector.broadcast %cst_15 : f32 to vector<8x128xf32>
    %22 = arith.mulf %21, %20 : vector<8x128xf32>
    %23 = math.tanh %22 : vector<8x128xf32>
    %cst_16 = arith.constant 5.000000e-01 : f32
    %24 = vector.broadcast %cst_16 : f32 to vector<8x128xf32>
    %25 = arith.mulf %24, %23 : vector<8x128xf32>
    %cst_17 = arith.constant 5.000000e-01 : f32
    %26 = vector.broadcast %cst_17 : f32 to vector<8x128xf32>
    %27 = arith.addf %25, %26 : vector<8x128xf32>
    %28 = arith.truncf %27 : vector<8x128xf32> to vector<8x128xbf16>
    %c1 = arith.constant 1 : index
    %c0_18 = arith.constant 0 : index
    %c0_19 = arith.constant 0 : index
    %29 = vector.load %arg4[%c1, %c0_18, %c0_19] : memref<2x128x128xbf16, #tpu.memory_space<vmem>>, vector<1x128x128xbf16>
    %30 = vector.shape_cast %29 : vector<1x128x128xbf16> to vector<128x128xbf16>
    %cst_20 = arith.constant dense<0.000000e+00> : vector<8x128xf32>
    %31 = tpu.matmul %28, %30, %cst_20 {dimension_numbers = #tpu.dot_dimension_numbers<[1], [0], [0], [1], [0, 0, 1, 1], [], []>} : vector<8x128xbf16>, vector<128x128xbf16>, vector<8x128xf32> -> vector<8x128xf32>
    %c1_21 = arith.constant 1 : index
    %c0_22 = arith.constant 0 : index
    %c0_23 = arith.constant 0 : index
    %32 = vector.load %arg5[%c1_21, %c0_22, %c0_23] : memref<2x1x128xf32, #tpu.memory_space<vmem>>, vector<1x1x128xf32>
    %33 = vector.shape_cast %32 : vector<1x1x128xf32> to vector<1x128xf32>
    %34 = vector.broadcast %33 : vector<1x128xf32> to vector<8x128xf32>
    %35 = arith.addf %31, %34 : vector<8x128xf32>
    %cst_24 = arith.constant 5.000000e-01 : f32
    %36 = vector.broadcast %cst_24 : f32 to vector<8x128xf32>
    %37 = arith.mulf %36, %35 : vector<8x128xf32>
    %38 = math.tanh %37 : vector<8x128xf32>
    %cst_25 = arith.constant 5.000000e-01 : f32
    %39 = vector.broadcast %cst_25 : f32 to vector<8x128xf32>
    %40 = arith.mulf %39, %38 : vector<8x128xf32>
    %cst_26 = arith.constant 5.000000e-01 : f32
    %41 = vector.broadcast %cst_26 : f32 to vector<8x128xf32>
    %42 = arith.addf %40, %41 : vector<8x128xf32>
    %43 = arith.truncf %42 : vector<8x128xf32> to vector<8x128xbf16>
    %c0_27 = arith.constant 0 : index
    %c0_28 = arith.constant 0 : index
    %44 = vector.load %arg6[%c0_27, %c0_28] : memref<128x8xbf16, #tpu.memory_space<vmem>>, vector<128x8xbf16>
    %cst_29 = arith.constant dense<0.000000e+00> : vector<8x8xf32>
    %45 = tpu.matmul %43, %44, %cst_29 {dimension_numbers = #tpu.dot_dimension_numbers<[1], [0], [0], [1], [0, 0, 1, 1], [], []>} : vector<8x128xbf16>, vector<128x8xbf16>, vector<8x8xf32> -> vector<8x8xf32>
    %c0_30 = arith.constant 0 : index
    %c0_31 = arith.constant 0 : index
    %46 = vector.load %arg7[%c0_30, %c0_31] : memref<1x8xf32, #tpu.memory_space<vmem>>, vector<1x8xf32>
    %47 = vector.broadcast %46 : vector<1x8xf32> to vector<8x8xf32>
    %48 = arith.addf %45, %47 : vector<8x8xf32>
    %c0_32 = arith.constant 0 : index
    %c0_33 = arith.constant 0 : index
    %49 = vector.load %arg8[%c0_32, %c0_33] : memref<8x8xf32, #tpu.memory_space<vmem>>, vector<8x8xf32>
    tpu.vector_store %arg8[%c0_32, %c0_33], %48 {strides = array<i32>} : memref<8x8xf32, #tpu.memory_space<vmem>>, vector<8x8xf32>,
    return
  }
  func.func @transform_0(%arg0: i32) -> (i32, i32) {
    %c0_i32 = arith.constant 0 : i32
    %c0_i32_0 = arith.constant 0 : i32
    return %arg0, %c0_i32 : i32, i32
  }
  func.func @transform_1(%arg0: i32) -> (i32, i32) {
    %c0_i32 = arith.constant 0 : i32
    %c0_i32_0 = arith.constant 0 : i32
    %c0_i32_1 = arith.constant 0 : i32
    return %c0_i32, %c0_i32_0 : i32, i32
  }
  func.func @transform_2(%arg0: i32) -> (i32, i32) {
    %c0_i32 = arith.constant 0 : i32
    %c0_i32_0 = arith.constant 0 : i32
    %c0_i32_1 = arith.constant 0 : i32
    return %c0_i32, %c0_i32_0 : i32, i32
  }
  func.func @transform_3(%arg0: i32) -> (i32, i32, i32) {
    %c0_i32 = arith.constant 0 : i32
    %c0_i32_0 = arith.constant 0 : i32
    %c0_i32_1 = arith.constant 0 : i32
    %c0_i32_2 = arith.constant 0 : i32
    return %c0_i32, %c0_i32_0, %c0_i32_1 : i32, i32, i32
  }
  func.func @transform_4(%arg0: i32) -> (i32, i32, i32) {
    %c0_i32 = arith.constant 0 : i32
    %c0_i32_0 = arith.constant 0 : i32
    %c0_i32_1 = arith.constant 0 : i32
    %c0_i32_2 = arith.constant 0 : i32
    return %c0_i32, %c0_i32_0, %c0_i32_1 : i32, i32, i32
  }
  func.func @transform_5(%arg0: i32) -> (i32, i32) {
    %c0_i32 = arith.constant 0 : i32
    %c0_i32_0 = arith.constant 0 : i32
    %c0_i32_1 = arith.constant 0 : i32
    return %c0_i32, %c0_i32_0 : i32, i32
  }
  func.func @transform_6(%arg0: i32) -> (i32, i32) {
    %c0_i32 = arith.constant 0 : i32
    %c0_i32_0 = arith.constant 0 : i32
    %c0_i32_1 = arith.constant 0 : i32
    return %c0_i32, %c0_i32_0 : i32, i32
  }
  func.func @transform_7(%arg0: i32) -> (i32, i32) {
    %c0_i32 = arith.constant 0 : i32
    %c0_i32_0 = arith.constant 0 : i32
    return %arg0, %c0_i32 : i32, i32
  }
}

</mosaic_0001>

<bundles_post_ra>
// kernel: mlp_forward.1
= control target key start
LH: loop header
LB: loop body
LE: loop exit
PB: predicated region body
PF: predicated region fallthrough
CT: control target
= control target key end

     0   :  { %12 = vsyncpa [#allocation3], 0  ;;  %s638_s0 = inlined_call_operand.vmem [shape: bf16[8,16], index: 0, kind: input, shape index: {}]   ;;  %s639_s1 = inlined_call_operand.vmem [shape: bf16[16,128], index: 1, kind: input, shape index: {}]   ;;  %s640_s2 = inlined_call_operand.vmem [shape: f32[1,128], index: 2, kind: input, shape index: {}]   ;;  %s641_s3 = inlined_call_operand.hbm [shape: bf16[2,128,128], index: 3, kind: input, shape index: {}]   ;;  %s642_s4 = inlined_call_operand.vmem [shape: f32[2,1,128], index: 4, kind: input, shape index: {}]   ;;  %s643_s5 = inlined_call_operand.vmem [shape: bf16[128,8], index: 5, kind: input, shape index: {}]   ;;  %s644_s6 = inlined_call_operand.vmem [shape: f32[1,8], index: 6, kind: input, shape index: {}]   ;;  %s645_s7 = inlined_call_operand.hbm [shape: f32[8,8], index: 7, kind: output, shape index: {}]  }
   0x1   :  { %13 = vsyncpa [#allocation4], 0  ;;  %s24_s26 = sshll.u32 %s641_s3, 4  ;;  %s546_s27 = smov [#allocation2]   ;;  %s25_s26 = int_to_ptr.hbm [resolvable:$true] %s24_s26 }
   0x2   :  { %s26_s28 = sshll.u32 %s546_s27, 4  ;;  %s547_s29 = smov 64   ;;  %s27_s28 = int_to_ptr.vmem [resolvable:$true] %s26_s28 }
   0x3   :  { %s548_s30 = smov 4  }
   0x4   :  { %32 = dma.hbm_to_vmem [thread:$0]  %s25_s26, 2048, %s27_s28, [#allocation3], %s547_s29, %s547_s29, %s548_s30  }
   0x5   :  { %542 = dma.done.wait [#allocation3], 2048  }
   0x6   :  { %543 = vsyncadd [#allocation3], 4294965248  ;;  %v455_v0 = vld [vmem:[%s639_s1] sm:$0xff]  ;;  %v463_v1 = vld [vmem:[#allocation2 + $0x38] sm:$0xff]  ;;  %vm57_vm0 = vcmask 130048   ;;  %vm334_vm1 = vcmask 64512  }
   0x7   :  { %v44_v2 = vld [vmem:[%s638_s0] sm:$0xf]  ;;  %68 = vmatpush.bf16.msra.mxu0 %v455_v0  ;;  %147 = vmatpush.bf16.msra.mxu1 %v463_v1  ;;  %v462_v3 = vld [vmem:[#allocation2 + $0x30] sm:$0xff]  ;;  %v461_v4 = vld [vmem:[#allocation2 + $0x28] sm:$0xff] }
   0x8   :  { %v460_v5 = vld [vmem:[#allocation2 + $0x20] sm:$0xff]  ;;  %v459_v6 = vld [vmem:[#allocation2 + $0x18] sm:$0xff]  ;;  %v458_v7 = vld [vmem:[#allocation2 + $0x10] sm:$0xff] }
   0x9   :  { %v457_v8 = vld [vmem:[#allocation2 + $0x8] sm:$0xff]  ;;  %v456_v9 = vld [vmem:[#allocation2] sm:$0xff]  ;;  %v471_v10 = vld [vmem:[#allocation2 + $0x78] sm:$0xff] }
   0xa   :  { %357 = vmatmul.msk.bf16.vlgmr.msra.gmra.mxu0 %vm57_vm0, %v44_v2  ;;  %235 = vmatpush.bf16.msra.mxu2 %v471_v10  ;;  %v470_v11 = vld [vmem:[#allocation2 + $0x70] sm:$0xff]  ;;  %v469_v12 = vld [vmem:[#allocation2 + $0x68] sm:$0xff]  ;;  %v468_v13 = vld [vmem:[#allocation2 + $0x60] sm:$0xff] }
   0xb   :  { %148 = vmatpush.bf16.msra.mxu1 %v462_v3  ;;  %v484_v14 = vld [vmem:[%s640_s2] ss:$0 sm:$0xff]  ;;  %v467_v23 = vld [vmem:[#allocation2 + $0x58] sm:$0xff]  ;;  %v466_v24 = vld [vmem:[#allocation2 + $0x50] sm:$0xff] }
   0xc   :  { %v465_v25 = vld [vmem:[#allocation2 + $0x48] sm:$0xff]  ;;  %v464_v26 = vld [vmem:[#allocation2 + $0x40] sm:$0xff]  ;;  %v479_v27 = vld [vmem:[%s643_s5 + $0x38] sm:$0xff] }
   0xd   :  { %321 = vmatpush.bf16.msra.mxu3 %v479_v27  ;;  %v478_v28 = vld [vmem:[%s643_s5 + $0x30] sm:$0xff]  ;;  %v477_v29 = vld [vmem:[%s643_s5 + $0x28] sm:$0xff]  ;;  %v476_v30 = vld [vmem:[%s643_s5 + $0x20] sm:$0xff] }
   0xe   :  { %236 = vmatpush.bf16.msra.mxu2 %v470_v11  ;;  %v485_v31 = vld [vmem:[%s642_s4] ss:$0 sm:$0xff]  ;;  %v475_v40 = vld [vmem:[%s643_s5 + $0x18] sm:$0xff]  ;;  %v474_v41 = vld [vmem:[%s643_s5 + $0x10] sm:$0xff] }
   0xf   :  { %149 = vmatpush.bf16.msra.mxu1 %v461_v4  ;;  %v473_v42 = vld [vmem:[%s643_s5 + $0x8] sm:$0xff]  ;;  %v472_v43 = vld [vmem:[%s643_s5] sm:$0xff]  ;;  %s549_s5 = smov [#allocation5]  }
  0x10   :  { %v486_v44 = vld [vmem:[%s642_s4 + $0x1] ss:$0 sm:$0xff]  ;;  %v487_v53 = vld [vmem:[%s644_s6] ss:$0 sm:$0xff]  ;;  %s341_s9 = sshll.u32 %s549_s5, 4  ;;  %s343_s4 = sshll.u32 %s645_s7, 4  ;;  %s342_s9 = int_to_ptr.vmem [resolvable:$true] %s341_s9  ;;  %s344_s4 = int_to_ptr.hbm [resolvable:$true] %s343_s4 }
  0x11   :  { %322 = vmatpush.bf16.msra.mxu3 %v478_v28 }
  0x12   :  { %237 = vmatpush.bf16.msra.mxu2 %v469_v12 }
  0x13   :  { %150 = vmatpush.bf16.msra.mxu1 %v460_v5 }
  0x15   :  { %323 = vmatpush.bf16.msra.mxu3 %v477_v29 }
  0x16   :  { %238 = vmatpush.bf16.msra.mxu2 %v468_v13 }
  0x17   :  { %151 = vmatpush.bf16.msra.mxu1 %v459_v6 }
  0x19   :  { %324 = vmatpush.bf16.msra.mxu3 %v476_v30 }
  0x1a   :  { %239 = vmatpush.bf16.msra.mxu2 %v467_v23 }
  0x1b   :  { %152 = vmatpush.bf16.msra.mxu1 %v458_v7 }
  0x1d   :  { %325 = vmatpush.bf16.msra.mxu3 %v475_v40 }
  0x1e   :  { %240 = vmatpush.bf16.msra.mxu2 %v466_v24 }
  0x1f   :  { %153 = vmatpush.bf16.msra.mxu1 %v457_v8 }
  0x21   :  { %326 = vmatpush.bf16.msra.mxu3 %v474_v41 }
  0x22   :  { %241 = vmatpush.bf16.msra.mxu2 %v465_v25 }
  0x23   :  { %154 = vmatpush.bf16.msra.mxu1 %v456_v9 }
  0x25   :  { %327 = vmatpush.bf16.msra.mxu3 %v473_v42 }
  0x26   :  { %242 = vmatpush.bf16.msra.mxu2 %v464_v26 }
  0x29   :  { %328 = vmatpush.bf16.msra.mxu3 %v472_v43 }
  0x87   :  { %v70_v15 = vpop.f32.mrf.mxu0 }
  0x88   :  { %v71_v16 = vadd.f32 %v484_v14, %v70_v15 }
  0x8a   :  { %v74_v17 = vmul.f32 0.5, %v71_v16 }
  0x8c   :  { %488 = vtanh.f32 %v74_v17 }
  0x8f   :  { %v72_v18 = vpop.f32.mrf.mxu0 }
  0x92   :  { %v489_v19 = vpop.eup %488 }
  0x93   :  { %v76_v20 = vmul.f32 0.5, %v489_v19 }
  0x95   :  { %v77_v21 = vadd.f32 0.5, %v76_v20 }
  0x97   :  { %v78_v22 = vpack.c.bf16 %v77_v21, %v77_v21 }
  0x99   :  { %155 = vmatmul.bf16.vlgmr.msra.gmra.mxu1 %v78_v22 }
 0x116   :  { %v156_v32 = vpop.f32.mrf.mxu1 }
 0x117   :  { %v157_v33 = vadd.f32 %v485_v31, %v156_v32 }
 0x119   :  { %v160_v34 = vmul.f32 0.5, %v157_v33 }
 0x11b   :  { %490 = vtanh.f32 %v160_v34 }
 0x11e   :  { %v158_v35 = vpop.f32.mrf.mxu1 }
 0x121   :  { %v491_v36 = vpop.eup %490 }
 0x122   :  { %v162_v37 = vmul.f32 0.5, %v491_v36 }
 0x124   :  { %v163_v38 = vadd.f32 0.5, %v162_v37 }
 0x126   :  { %v164_v39 = vpack.c.bf16 %v163_v38, %v163_v38 }
 0x128   :  { %243 = vmatmul.bf16.vlgmr.msra.gmra.mxu2 %v164_v39 }
 0x1ab   :  { %v244_v45 = vpop.f32.mrf.mxu2 }
 0x1ac   :  { %v245_v46 = vadd.f32 %v486_v44, %v244_v45 }
 0x1ae   :  { %v248_v47 = vmul.f32 0.5, %v245_v46 }
 0x1b0   :  { %492 = vtanh.f32 %v248_v47 }
 0x1b3   :  { %v246_v48 = vpop.f32.mrf.mxu2 }
 0x1b6   :  { %v493_v49 = vpop.eup %492 }
 0x1b7   :  { %v250_v50 = vmul.f32 0.5, %v493_v49 }
 0x1b9   :  { %v251_v51 = vadd.f32 0.5, %v250_v50 }
 0x1bb   :  { %v252_v52 = vpack.c.bf16 %v251_v51, %v251_v51 }
 0x1bd   :  { %329 = vmatmul.bf16.vlgmr.msra.gmra.mxu3 %v252_v52 }
 0x240   :  { %v330_v54 = vpop.f32.mrf.mxu3 }
 0x241   :  { %v331_v55 = vadd.f32 %v487_v53, %v330_v54 }
 0x243   :  { %335 = vst.msk [vmem:[#allocation5] sm:$0xff] %vm334_vm1, %v331_v55 }
 0x244   :  { %346 = dma.vmem_to_hbm [thread:$0]  %s342_s9, 128, %s344_s4, [#allocation4]  }
 0x248   :  { %v332_v56 = vpop.f32.mrf.mxu3 }
 0x249   :  { %544 = dma.done.wait [#allocation4], 128  }
 0x24a   :  { %545 = vsyncadd [#allocation4], 4294967168 }
 0x24b   :  { %351 = vsyncpa [#allocation3], 1 }
 0x24c   :  { %352 = vsyncpa [#allocation4], 1 }

</bundles_post_ra>
